<compile_context>
chip_gen: v7x
topology: tpu7x:2x2x1
jax: 0.10.0
libtpu: 0.0.40
codegen_flags: <defaults>
</compile_context>

<pallas_src>
import math
from functools import partial

import jax
import jax.numpy as jnp
import numpy as np
from jax.experimental import pallas as pl
from jax.experimental.pallas import tpu as pltpu

SQRT2 = math.sqrt(2.0)
INV_SQRT2 = 1.0 / SQRT2

BLUR_TAPS = 4
# 1-D taps of the separable [1,3,3,1] blur, normalized (outer product == 2D kernel).
BLUR_1D = (1.0 / 8.0, 3.0 / 8.0, 3.0 / 8.0, 1.0 / 8.0)


def _round_up(x, m):
    return (x + m - 1) // m * m


def _choose_tiles(dim, max_tile, align):
    """Return (tile, padded_dim). Prefer tiles that divide exactly (no padding)."""
    d = _round_up(max(dim, align), align)
    if d <= max_tile:
        return d, d
    for t in (max_tile, 3 * max_tile // 4, max_tile // 2):
        if t % align == 0 and d % t == 0:
            return t, d
    return max_tile, _round_up(d, max_tile)


# ---------------------------------------------------------------------------
# Pallas kernels
# ---------------------------------------------------------------------------

def _mm_kernel(*refs, act, has_res):
    """Tiled matmul (bf16 in, f32 acc) + bias / fused-leaky-relu / residual epilogue."""
    if has_res:
        x_ref, w_ref, b_ref, r_ref, o_ref, acc_ref = refs
    else:
        x_ref, w_ref, b_ref, o_ref, acc_ref = refs
        r_ref = None

    k = pl.program_id(2)

    @pl.when(k == 0)
    def _():
        acc_ref[...] = jnp.zeros_like(acc_ref)

    acc_ref[...] += jnp.dot(x_ref[...], w_ref[...],
                            preferred_element_type=jnp.float32)

    @pl.when(k == pl.num_programs(2) - 1)
    def _():
        r = acc_ref[...] + b_ref[...]
        if act == "flrelu":    # fused_leaky_relu: leaky(x + b, 0.2) * sqrt(2)
            r = jnp.where(r >= 0, r, 0.2 * r) * SQRT2
        if has_res:            # ResBlock merge: (skip + out) / sqrt(2)
            r = (r + r_ref[...].astype(jnp.float32)) * INV_SQRT2
        o_ref[...] = r.astype(o_ref.dtype)


def matmul_bias_act(x, w, bias=None, act="none", res=None,
                    out_dtype=jnp.bfloat16):
    """out = epilogue(x @ w + bias [, res]).   x:(M,K)  w:(K,N)  res:(M,N)."""
    M, K = x.shape
    K2, N = w.shape
    assert K == K2
    tm, Mp = _choose_tiles(M, 256, 8)
    tn, Np = _choose_tiles(N, 256, 128)
    tk, Kp = _choose_tiles(K, 512, 128)

    xp = x.astype(jnp.bfloat16)
    if (Mp, Kp) != (M, K):
        xp = jnp.pad(xp, ((0, Mp - M), (0, Kp - K)))
    wp = w.astype(jnp.bfloat16)
    if (Kp, Np) != (K, N):
        wp = jnp.pad(wp, ((0, Kp - K), (0, Np - N)))
    if bias is None:
        bp = jnp.zeros((1, Np), jnp.float32)
    else:
        bp = bias.astype(jnp.float32).reshape(1, N)
        if Np != N:
            bp = jnp.pad(bp, ((0, 0), (0, Np - N)))

    has_res = res is not None
    inputs = [xp, wp, bp]
    in_specs = [
        pl.BlockSpec((tm, tk), lambda i, j, k: (i, k)),
        pl.BlockSpec((tk, tn), lambda i, j, k: (k, j)),
        pl.BlockSpec((1, tn), lambda i, j, k: (0, j)),
    ]
    if has_res:
        rp = res
        if (Mp, Np) != tuple(res.shape):
            rp = jnp.pad(rp, ((0, Mp - M), (0, Np - N)))
        inputs.append(rp)
        in_specs.append(pl.BlockSpec((tm, tn), lambda i, j, k: (i, j)))

    out = pl.pallas_call(
        partial(_mm_kernel, act=act, has_res=has_res),
        out_shape=jax.ShapeDtypeStruct((Mp, Np), out_dtype),
        grid_spec=pltpu.PrefetchScalarGridSpec(
            num_scalar_prefetch=0,
            grid=(Mp // tm, Np // tn, Kp // tk),
            in_specs=in_specs,
            out_specs=pl.BlockSpec((tm, tn), lambda i, j, k: (i, j)),
            scratch_shapes=[pltpu.VMEM((tm, tn), jnp.float32)],
        ),
        compiler_params=pltpu.CompilerParams(
            dimension_semantics=("parallel", "parallel", "arbitrary")),
    )(*inputs)
    if (Mp, Np) != (M, N):
        out = out[:M, :N]
    return out


def _blur_kernel(x_ref, o_ref, *, taps):
    """Separable [1,3,3,1] blur: W pass (4 taps) then H pass (4 taps)."""
    Ho, Wo = o_ref.shape[1], o_ref.shape[2]
    xv = x_ref[...].astype(jnp.float32)
    # horizontal (W) pass
    row = taps[0] * xv[:, :, 0:Wo, :]
    for j in range(1, BLUR_TAPS):
        row = row + taps[j] * xv[:, :, j:j + Wo, :]
    # vertical (H) pass
    acc = taps[0] * row[:, 0:Ho, :, :]
    for i in range(1, BLUR_TAPS):
        acc = acc + taps[i] * row[:, i:i + Ho, :, :]
    o_ref[...] = acc.astype(o_ref.dtype)


def blur(x, pad):
    """Blur(x) == upfirdn2d(x, outer([1,3,3,1]), pad=pad).  x: NHWC."""
    pad0, pad1 = pad
    xp = jnp.pad(x, ((0, 0), (pad0, pad1), (pad0, pad1), (0, 0)))
    B, Hp, Wp, C = xp.shape
    Ho, Wo = Hp - (BLUR_TAPS - 1), Wp - (BLUR_TAPS - 1)
    tc = 128 if C % 128 == 0 else C       # channel tiling keeps VMEM bounded
    return pl.pallas_call(
        partial(_blur_kernel, taps=BLUR_1D),
        out_shape=jax.ShapeDtypeStruct((B, Ho, Wo, C), x.dtype),
        grid=(B, C // tc),
        in_specs=[pl.BlockSpec((1, Hp, Wp, tc), lambda b, c: (b, 0, 0, c))],
        out_specs=pl.BlockSpec((1, Ho, Wo, tc), lambda b, c: (b, 0, 0, c)),
        compiler_params=pltpu.CompilerParams(
            dimension_semantics=("parallel", "parallel")),
    )(xp)


# ---------------------------------------------------------------------------
# Conv / linear building blocks (thin JAX glue around the Pallas matmul kernel)
# ---------------------------------------------------------------------------

def _im2col(x, kh, kw, stride):
    # TODO(synk): fuse this patch extraction into the matmul kernel to avoid
    #             kh*kw x HBM amplification of the activation reads.
    B, H, W, C = x.shape
    Ho = (H - kh) // stride + 1
    Wo = (W - kw) // stride + 1
    cols = []
    for i in range(kh):
        for j in range(kw):
            cols.append(x[:, i:i + (Ho - 1) * stride + 1:stride,
                          j:j + (Wo - 1) * stride + 1:stride, :])
    patches = jnp.concatenate(cols, axis=-1)          # (B,Ho,Wo,kh*kw*C)
    return patches.reshape(B * Ho * Wo, kh * kw * C), (B, Ho, Wo)


def conv2d(x, w_oihw, bias=None, stride=1, padding=0, act="none",
           w_scale=1.0, res=None, out_dtype=jnp.bfloat16):
    """x: NHWC, w: (Cout, Cin, KH, KW) as in PyTorch. Optional fused residual."""
    if padding > 0:
        x = jnp.pad(x, ((0, 0), (padding, padding), (padding, padding), (0, 0)))
    Cout, Cin, KH, KW = w_oihw.shape
    patches, (B, Ho, Wo) = _im2col(x, KH, KW, stride)
    wm = jnp.transpose(w_oihw, (2, 3, 1, 0)).reshape(KH * KW * Cin, Cout)
    if w_scale != 1.0:
        wm = wm * w_scale
    res_flat = None if res is None else res.reshape(B * Ho * Wo, Cout)
    out = matmul_bias_act(patches, wm, bias, act=act, res=res_flat,
                          out_dtype=out_dtype)
    return out.reshape(B, Ho, Wo, Cout)


def conv_layer(x, p, down_sample=False, activate=True, res=None):
    """ConvLayer: [Blur if downsample] + EqualConv2d + [FusedLeakyReLU] (+ fused residual)."""
    w = p['w']
    kernel_size = w.shape[-1]
    in_channel = w.shape[1]
    scale = 1.0 / math.sqrt(in_channel * kernel_size ** 2)
    if down_sample:
        factor = 2
        pp = BLUR_TAPS - factor + (kernel_size - 1)
        pad0 = (pp + 1) // 2
        pad1 = pp // 2
        x = blur(x, (pad0, pad1))
        stride, padding = 2, 0
    else:
        stride, padding = 1, (kernel_size - 1) // 2
    act = "flrelu" if activate else "none"
    return conv2d(x, w, p.get('b', None), stride=stride, padding=padding,
                  act=act, w_scale=scale, res=res)


def res_block(x, p, first_downsample=False):
    if first_downsample:
        out = conv_layer(x, p['conv1'], down_sample=True)
        out = conv_layer(out, p['conv2'])
    else:
        out = conv_layer(x, p['conv1'])
        out = conv_layer(out, p['conv2'], down_sample=True)
    # skip conv with the residual merge (out + skip)/sqrt(2) fused into its epilogue
    return conv_layer(x, p['skip'], down_sample=True, activate=False, res=out)


def equal_linear(x, p, activation=None, lr_mul=1.0, out_dtype=jnp.bfloat16):
    w = p['w']                                   # (out_dim, in_dim)
    out_dim, in_dim = w.shape
    scale = 1.0 / math.sqrt(in_dim) * lr_mul
    wm = (w * scale).T
    b = p['b'] * lr_mul if p.get('b', None) is not None else None
    act = "flrelu" if activation else "none"
    return matmul_bias_act(x, wm, b, act=act, out_dtype=out_dtype)


# ---------------------------------------------------------------------------
# MultiScale(Aux)Discriminator forward
# ---------------------------------------------------------------------------

def multi_scale_discriminator(x_nhwc, params, alpha=1.0, first_downsample=False):
    # stddev_group == 0 in MultiScaleAuxDiscriminator -> minibatch-stddev skipped
    assert alpha >= 1.0  # TODO(synk): alpha<1 bilinear-downsample blending branch not implemented
    size = x_nhwc.shape[2]
    log_size = int(math.log(size, 2))
    x = x_nhwc.astype(jnp.bfloat16)              # activations kept in bf16

    cin = params['conv_in'][f'{2 ** log_size}']
    out = conv2d(x, cin['w'], cin['b'], stride=1, padding=1, act="none",
                 w_scale=1.0)                               # plain nn.Conv2d
    out = res_block(out, params['convs'][f'{2 ** log_size}'], first_downsample)
    for i in range(log_size - 1, 2, -1):
        out = res_block(out, params['convs'][f'{2 ** i}'], first_downsample)

    out = conv_layer(out, params['final_conv'])             # -> (B,4,4,ch4)
    B = out.shape[0]
    # torch flattens NCHW: transpose back before .reshape(batch, -1)
    out = jnp.transpose(out, (0, 3, 1, 2)).reshape(B, -1)
    out = equal_linear(out, params['space_linear'], activation='fused_lrelu')
    out = equal_linear(out, params['out_linear'], activation=None,
                       out_dtype=jnp.float32)
    return out


def multi_scale_aux_discriminator(x_nchw, params, use_aux_disc=False, alpha=1.0):
    x = jnp.transpose(x_nchw, (0, 2, 3, 1))                 # NCHW -> NHWC
    if use_aux_disc:
        b = x.shape[0] // 2
        main_out = multi_scale_discriminator(x[:b], params['main'], alpha,
                                             first_downsample=False)
        aux_out = multi_scale_discriminator(x[b:], params['aux'], alpha,
                                            first_downsample=True)
        out = jnp.concatenate([main_out, aux_out], axis=0)
    else:
        out = multi_scale_discriminator(x, params['main'], alpha,
                                        first_downsample=False)
    return out, None, None   # (out, latent, position)


# ---------------------------------------------------------------------------
# Deterministic parameter init (shapes follow the PyTorch module __init__)
# ---------------------------------------------------------------------------

def init_discriminator_params(key, max_size, channels, input_size=3):
    log_size = int(math.log(max_size, 2))
    keys = iter(jax.random.split(key, 256))
    params = {'conv_in': {}, 'convs': {}}

    # nn.Conv2d(input_size, ch, 3, padding=1) at each used scale
    for i in range(log_size, 2, -1):
        s = 2 ** i
        ch = channels[s]
        params['conv_in'][f'{s}'] = {
            'w': jax.random.normal(next(keys), (ch, input_size, 3, 3),
                                   jnp.float32) * 0.1,
            'b': jax.random.normal(next(keys), (ch,), jnp.float32) * 0.1,
        }

    in_ch = channels[max_size]
    for i in range(log_size, 2, -1):
        out_ch = channels[2 ** (i - 1)]
        params['convs'][f'{2 ** i}'] = {
            # conv1: EqualConv2d(in,in,3) (no conv bias) + FusedLeakyReLU bias
            'conv1': {'w': jax.random.normal(next(keys), (in_ch, in_ch, 3, 3),
                                             jnp.float32),
                      'b': jnp.zeros((in_ch,), jnp.float32)},
            # conv2: EqualConv2d(in,out,3) + FusedLeakyReLU bias
            'conv2': {'w': jax.random.normal(next(keys), (out_ch, in_ch, 3, 3),
                                             jnp.float32),
                      'b': jnp.zeros((out_ch,), jnp.float32)},
            # skip: EqualConv2d(in,out,1), no bias, no activation
            'skip': {'w': jax.random.normal(next(keys), (out_ch, in_ch, 1, 1),
                                            jnp.float32)},
        }
        in_ch = out_ch

    ch4 = channels[4]
    params['final_conv'] = {
        'w': jax.random.normal(next(keys), (ch4, in_ch, 3, 3), jnp.float32),
        'b': jnp.zeros((ch4,), jnp.float32)}
    params['space_linear'] = {
        'w': jax.random.normal(next(keys), (ch4, ch4 * 4 * 4), jnp.float32),
        'b': jnp.zeros((ch4,), jnp.float32)}
    params['out_linear'] = {
        'w': jax.random.normal(next(keys), (1, ch4), jnp.float32),
        'b': jnp.zeros((1,), jnp.float32)}
    return params


if __name__ == "__main__":
    key = jax.random.PRNGKey(0)
    k_in, k_main = jax.random.split(key)

    max_size = 16                      # small, power of 2
    # default channel dict of MultiScaleDiscriminator restricted to used scales
    channels = {4: 512, 8: 512, 16: 512}
    params = {'main': init_discriminator_params(k_main, max_size, channels,
                                                input_size=3)}

    x = jax.random.normal(k_in, (2, 3, max_size, max_size), jnp.float32)

    out, latent, position = multi_scale_aux_discriminator(
        x, params, use_aux_disc=False, alpha=1.0)
    out = jax.block_until_ready(out)

    assert out.shape == (2, 1) and out.dtype == jnp.float32
    assert latent is None and position is None
    assert bool(jnp.all(jnp.isfinite(out)))
    print("KERNEL_OK")
</pallas_src>

<mosaic_0001>
module attributes {stable_mosaic.version = 11 : i64} {
  func.func @_mm_kernel(%arg0: i32, %arg1: i32, %arg2: i32, %arg3: memref<256x128xbf16, #tpu.memory_space<vmem>>, %arg4: memref<128x256xbf16, #tpu.memory_space<vmem>>, %arg5: memref<1x256xf32, #tpu.memory_space<vmem>>, %arg6: memref<256x256xbf16, #tpu.memory_space<vmem>>, %arg7: memref<256x256xf32, #tpu.memory_space<vmem>>) attributes {dimension_semantics = [#tpu.dimension_semantics<parallel>, #tpu.dimension_semantics<parallel>, #tpu.dimension_semantics<arbitrary>], iteration_bounds = array<i64: 2, 2, 1>, scalar_prefetch = 0 : i64, scratch_operands = 1 : i64, tpu.core_type = #tpu.core_type<tc>, window_params = [{transform_indices = @transform_0, window_bounds = array<i64: 256, 128>}, {transform_indices = @transform_1, window_bounds = array<i64: 128, 256>}, {transform_indices = @transform_2, window_bounds = array<i64: 1, 256>}, {transform_indices = @transform_3, window_bounds = array<i64: 256, 256>}]} {
    %c0_i32 = arith.constant 0 : i32
    %0 = arith.cmpi eq, %arg2, %c0_i32 : i32
    %1 = arith.extui %0 : i1 to i32
    %c0_i32_0 = arith.constant 0 : i32
    %2 = arith.cmpi ne, %1, %c0_i32_0 : i32
    scf.if %2 {
      %cst_10 = arith.constant 0.000000e+00 : f32
      %12 = vector.broadcast %cst_10 : f32 to vector<256x256xf32>
      %c0_11 = arith.constant 0 : index
      %c0_12 = arith.constant 0 : index
      %13 = vector.load %arg7[%c0_11, %c0_12] : memref<256x256xf32, #tpu.memory_space<vmem>>, vector<256x256xf32>
      tpu.vector_store %arg7[%c0_11, %c0_12], %12 {strides = array<i32>} : memref<256x256xf32, #tpu.memory_space<vmem>>, vector<256x256xf32>,
    } else {
    }
    %c0 = arith.constant 0 : index
    %c0_1 = arith.constant 0 : index
    %3 = vector.load %arg7[%c0, %c0_1] : memref<256x256xf32, #tpu.memory_space<vmem>>, vector<256x256xf32>
    %c0_2 = arith.constant 0 : index
    %c0_3 = arith.constant 0 : index
    %4 = vector.load %arg3[%c0_2, %c0_3] : memref<256x128xbf16, #tpu.memory_space<vmem>>, vector<256x128xbf16>
    %c0_4 = arith.constant 0 : index
    %c0_5 = arith.constant 0 : index
    %5 = vector.load %arg4[%c0_4, %c0_5] : memref<128x256xbf16, #tpu.memory_space<vmem>>, vector<128x256xbf16>
    %cst = arith.constant dense<0.000000e+00> : vector<256x256xf32>
    %6 = tpu.matmul %4, %5, %cst {dimension_numbers = #tpu.dot_dimension_numbers<[1], [0], [0], [1], [0, 0, 1, 1], [], []>} : vector<256x128xbf16>, vector<128x256xbf16>, vector<256x256xf32> -> vector<256x256xf32>
    %7 = arith.addf %3, %6 : vector<256x256xf32>
    %c0_6 = arith.constant 0 : index
    %c0_7 = arith.constant 0 : index
    %8 = vector.load %arg7[%c0_6, %c0_7] : memref<256x256xf32, #tpu.memory_space<vmem>>, vector<256x256xf32>
    tpu.vector_store %arg7[%c0_6, %c0_7], %7 {strides = array<i32>} : memref<256x256xf32, #tpu.memory_space<vmem>>, vector<256x256xf32>,
    %c0_i32_8 = arith.constant 0 : i32
    %9 = arith.cmpi eq, %arg2, %c0_i32_8 : i32
    %10 = arith.extui %9 : i1 to i32
    %c0_i32_9 = arith.constant 0 : i32
    %11 = arith.cmpi ne, %10, %c0_i32_9 : i32
    scf.if %11 {
      %c0_10 = arith.constant 0 : index
      %c0_11 = arith.constant 0 : index
      %12 = vector.load %arg7[%c0_10, %c0_11] : memref<256x256xf32, #tpu.memory_space<vmem>>, vector<256x256xf32>
      %c0_12 = arith.constant 0 : index
      %c0_13 = arith.constant 0 : index
      %13 = vector.load %arg5[%c0_12, %c0_13] : memref<1x256xf32, #tpu.memory_space<vmem>>, vector<1x256xf32>
      %14 = vector.broadcast %13 : vector<1x256xf32> to vector<256x256xf32>
      %15 = arith.addf %12, %14 : vector<256x256xf32>
      %16 = arith.truncf %15 : vector<256x256xf32> to vector<256x256xbf16>
      %c0_14 = arith.constant 0 : index
      %c0_15 = arith.constant 0 : index
      %17 = vector.load %arg6[%c0_14, %c0_15] : memref<256x256xbf16, #tpu.memory_space<vmem>>, vector<256x256xbf16>
      tpu.vector_store %arg6[%c0_14, %c0_15], %16 {strides = array<i32>} : memref<256x256xbf16, #tpu.memory_space<vmem>>, vector<256x256xbf16>,
    } else {
    }
    return
  }
  func.func @transform_0(%arg0: i32, %arg1: i32, %arg2: i32) -> (i32, i32) {
    %c0_i32 = arith.constant 0 : i32
    return %arg0, %arg2 : i32, i32
  }
  func.func @transform_1(%arg0: i32, %arg1: i32, %arg2: i32) -> (i32, i32) {
    %c0_i32 = arith.constant 0 : i32
    return %arg2, %arg1 : i32, i32
  }
  func.func @transform_2(%arg0: i32, %arg1: i32, %arg2: i32) -> (i32, i32) {
    %c0_i32 = arith.constant 0 : i32
    %c0_i32_0 = arith.constant 0 : i32
    return %c0_i32, %arg1 : i32, i32
  }
  func.func @transform_3(%arg0: i32, %arg1: i32, %arg2: i32) -> (i32, i32) {
    %c0_i32 = arith.constant 0 : i32
    return %arg0, %arg1 : i32, i32
  }
}

</mosaic_0001>

<bundles_post_ra>
// kernel: tpu_custom_call.1
= control target key start
LH: loop header
LB: loop body
LE: loop exit
PB: predicated region body
PF: predicated region fallthrough
CT: control target
= control target key end

     0   :  { %s2539_s0 = inlined_call_operand.hbm [shape: bf16[512,128], index: 0, kind: input, shape index: {}]   ;;  %s2540_s1 = inlined_call_operand.hbm [shape: bf16[128,512], index: 1, kind: input, shape index: {}]   ;;  %s2541_s2 = inlined_call_operand.vmem [shape: f32[1,512], index: 2, kind: input, shape index: {}]   ;;  %s2542_s3 = inlined_call_operand.hbm [shape: bf16[512,512], index: 3, kind: output, shape index: {}]  }
   0x1   :  { %2554 = sst [smem:[#allocation18_spill]] %s2539_s0 }
   0x2   :  { %2555 = sst [smem:[#allocation19_spill]] %s2541_s2 }
   0x3   :  { %2556 = sst [smem:[#allocation20_spill]] %s2542_s3 }
   0x4   :  { %8 = vsyncpa [#allocation4], 0 }
   0x5   :  { %10 = vsyncpa [#allocation4 + $0x1], 0 }
   0x6   :  { %11 = vsyncpa [#allocation7], 0 }
   0x7   :  { %13 = vsyncpa [#allocation7 + $0x1], 0 }
   0x8   :  { %14 = vsyncpa [#allocation5], 0 }
   0x9   :  { %16 = vsyncpa [#allocation5 + $0x1], 0  ;;  %s2032_s12 = smov 0   ;;  %s2034_s13 = smov 0  }
   0xa   :  { %s2036_s14 = smov 0   ;;  %s2038_s15 = smov 0  }
   0xb   :  { %s2040_s16 = smov 0   ;;  %s2042_s17 = smov 0  }
   0xc   :  { %s2044_s18 = smov 0   ;;  %s2046_s19 = smov 0  }
   0xd   :  { %s2048_s20 = smov 0   ;;  %s2050_s21 = smov 0  }
   0xe   :  { %s2052_s22 = smov 0   ;;  %s2054_s23 = smov 0  }
   0xf   :  { %s2056_s24 = smov 0   ;;  %s2058_s25 = smov 0  }
  0x10 LB: > { %2557 = sst [smem:[#allocation12_spill]] %s1986_s22  ;;  %s1471_s26 = sadd.s32 4294967295, %s1998_s25   ;;  %s1998_s25 = sphi %s2058_s25, %s22_s25   ;;  %s1994_s24 = sphi %s2056_s24, %s2591_s24   ;;  %s1990_s23 = sphi %s2054_s23, %s2602_s23   ;;  %s1986_s22 = sphi %s2052_s22, %s2589_s22   ;;  %s1982_s21 = sphi %s2050_s21, %s2601_s21   ;;  %s1978_s20 = sphi %s2048_s20, %s2600_s20   ;;  %s1974_s19 = sphi %s2046_s19, %s2599_s19   ;;  %s1970_s18 = sphi %s2044_s18, %s2598_s18   ;;  %s1966_s17 = sphi %s2042_s17, %s2597_s17   ;;  %s1962_s16 = sphi %s2040_s16, %s2596_s16   ;;  %s1958_s15 = sphi %s2038_s15, %s2595_s15   ;;  %s1954_s14 = sphi %s2036_s14, %s2594_s14   ;;  %s1950_s13 = sphi %s2034_s13, %s2593_s13   ;;  %s1946_s12 = sphi %s2032_s12, %s2592_s12  }
  0x11   : > { %2558 = sst [smem:[#allocation13_spill]] %s1994_s24  ;;  %p57_p0 = scmp.ne.s32.totalorder %s1978_s20, %s1974_s19 }
  0x12   : > { %p2544_p1 = scmp.eq.s32.totalorder %s1998_s25, 0  ;;  %p63_p2 = scmp.ne.s32.totalorder %s1974_s19, %s1970_s18 }
  0x13   : > { %p2107_p3 = scmp.eq.s32.totalorder %s1471_s26, 0  ;;  %p2111_p4 = scmp.eq.s32.totalorder %s1471_s26, 3 }
  0x14   : > { %p59_p5 = por %p2544_p1, %p57_p0  ;;  %p2543_p7 = scmp.lt.s32.totalorder %s1998_s25, 4 }
  0x15   : > { %s2560_s30 = scalar_select %p2111_p4, 1, 0 }
  0x16   : > { %p2119_p6 = por %p2107_p3, %p63_p2  ;;  %s169_s5 = sand.u32 1, %s1978_s20  }
  0x17   : > { %s1557_s6 = sshll.u32 %s1994_s24, 11  ;;  %s1475_s7 = sshll.u32 %s169_s5, 7 }
  0x18   : > { %s2561_s4 = scalar_select %p2119_p6, 1, 0 }
  0x19   : > { %s2562_s0 = sld [smem:[#allocation18_spill]]  ;;  %s173_s11 = scalar_lea.vmem [#allocation3], %s1475_s7 }
  0x1a   : > { %s181_s18 = sshll.u32 %s173_s11, 4  ;;  %p2133_p8 = pnand %p2543_p7, %p59_p5  ;;  %s2137_s18 = int_to_ptr.vmem [resolvable:$true] %s181_s18 }
  0x1b   : > { %s2139_s28 = scalar_lea.sflag [#allocation4], %s169_s5 }
  0x1c   : > { %p1790_p10 = pneg %p2133_p8 }
  0x1f   : > { %s2129_s10 = scalar_lea.hbm %s2562_s0, %s1557_s6  ;;  %s1793_s9 = scalar_lea.hbm %s2562_s0, 4096 }
  0x20   : > { %s1788_s8 = scalar_lea.hbm %s2129_s10, 2048  ;;  %p1794_p13 = scmp.lt.u32.totalorder %s2129_s10, %s2562_s0 }
  0x21   : > { %p1789_p9 = scmp.ne.s32.totalorder %s2129_s10, %s1788_s8  ;;  %p1795_p0 = scmp.lt.u32.totalorder %s1793_s9, %s1788_s8 }
  0x22   : > { %p1797_p5 = scmp.lt.u32.totalorder %s1788_s8, %s2129_s10 }
  0x23   : > { %p1791_p11 = pnand %p1790_p10, %p1789_p9  ;;  %p1796_p2 = por %p1795_p0, %p1794_p13 }
  0x25   : > { %p1792_p12 = pneg %p1791_p11  ;;  %p1798_p7 = por %p1797_p5, %p1796_p2 }
  0x27   : > { %p1799_p1 = pnand %p1798_p7, %p1792_p12 }
  0x29   : > { %1802 = shalt.err (!%p1799_p1)
}
  0x2a   : > { %s1803_s5 = scalar_lea.vmem %s2137_s18, 2048  ;;  %s2000_s6 = smov [#allocation3]  }
  0x2b   : > { %p1804_p9 = scmp.ne.s32.totalorder %s2137_s18, %s1803_s5  ;;  %s1808_s7 = sshll.u32 %s2000_s6, 4  ;;  %s1809_s7 = int_to_ptr.vmem [resolvable:$false] %s1808_s7 }
  0x2c   : > { %s1810_s27 = scalar_lea.vmem %s1809_s7, 4096  ;;  %p1811_p4 = scmp.lt.s32.totalorder %s2137_s18, %s1809_s7 }
  0x2d   : > { %p1806_p11 = pnand %p1804_p9, %p1790_p10  ;;  %p1812_p13 = scmp.lt.s32.totalorder %s1810_s27, %s1803_s5 }
  0x2f   : > { %p1807_p6 = pneg %p1806_p11  ;;  %p1813_p0 = por %p1812_p13, %p1811_p4 }
  0x31   : > { %p1814_p2 = pnand %p1813_p0, %p1807_p6 }
  0x33   : > { %1817 = shalt.err (!%p1814_p2)
}
  0x34   : > { %s2001_s8 = smov 64   ;;  %s2002_s9 = smov 4  }
  0x35   : > { %1617 = dma.hbm_to_vmem [thread:$0]  (!%p2133_p8), %s2129_s10, 2048, %s2137_s18, %s2139_s28, %s2001_s8, %s2001_s8, %s2002_s9  }
  0x36   : > { %p1481_p1 = scmp.ge.s32.totalorder %s1998_s25, 1  ;;  %p221_p4 = scmp.lt.s32.totalorder %s1998_s25, 5 }
  0x37   : > { %s1472_s5 = sadd.s32 4294967294, %s1998_s25   ;;  %s37_s6 = sadd.s32 1, %s1990_s23 }
  0x38   : > { %p2169_p6 = pnand %p1481_p1, %p221_p4  ;;  %s78_s7 = sadd.s32 1, %s1966_s17 }
  0x39   : > { %p39_p7 = scmp.ge.s32.totalorder %s37_s6, 2  ;;  %p85_p10 = scmp.ne.s32.totalorder %s1966_s17, %s1962_s16 }
  0x3a   : > { %p91_p12 = scmp.ne.s32.totalorder %s1962_s16, %s1958_s15  ;;  %s132_s26 = sadd.s32 1, %s1954_s14 }
  0x3b   : > { %s2604_s6 = smov (%p39_p7, %s37_s6), 0  ;;  %s2566_s28 = sadd.s32 1, %s1994_s24 }
  0x3c   : > { %2565 = sst [smem:[#allocation14_spill]] %s2604_s6  ;;  %s2606_s28 = smov (!%p39_p7, %s2566_s28), %s1994_s24 }
  0x3d   : > { %s74_s10 = ssub.s32 %s1990_s23, %s2604_s6  ;;  %p2567_p8 = scmp.eq.s32.totalorder %s1998_s25, 0 }
  0x3e   : > { %p43_p9 = scmp.ge.s32.totalorder %s2606_s28, 2  ;;  %p76_p11 = scmp.eq.s32.totalorder %s74_s10, 0 }
  0x3f   : > { %p2190_p5 = por %p85_p10, %p2567_p8  ;;  %p2196_p13 = por %p91_p12, %p2107_p3 }
  0x40   : > { %p142_p0 = scmp.ne.s32.totalorder %s1954_s14, %s1950_s13  ;;  %s2608_s28 = smov (%p43_p9, %s2606_s28), 0 }
  0x41   : > { %s2569_s15 = scalar_select %p2196_p13, 1, 0 }
  0x42   : > { %2570 = sst [smem:[#allocation15_spill]] %s2608_s28  ;;  %s45_s8 = ssub.s32 %s1994_s24, %s2608_s28 }
  0x43   : > { %s2205_s27 = scalar_select %p76_p11, %s1966_s17, %s78_s7  }
  0x44   : > { %p2572_p2 = scmp.ne.s32.totalorder %s2560_s30, 0  ;;  %p48_p4 = scmp.eq.s32.totalorder %s45_s8, 0 }
  0x45   : > { %2571 = sst [smem:[#allocation16_spill]] %s2205_s27  ;;  %s129_s29 = sor.u32 %s74_s10, %s45_s8 }
  0x46   : > { %p2211_p1 = por %p2572_p2, %p142_p0  ;;  %p130_p3 = scmp.eq.s32.totalorder %s129_s29, 0 }
  0x47   : > { %p148_p7 = scmp.ne.s32.totalorder %s1950_s13, %s1946_s12  ;;  %s2575_s0 = sadd.s32 1, %s1978_s20 }
  0x48   : > { %s2573_s9 = scalar_select %p2211_p1, 1, 0 }
  0x49   : > { %s2220_s6 = scalar_select %p48_p4, %s1978_s20, %s2575_s0  }
  0x4a   : > { %2574 = sst [smem:[#allocation17_spill]] %s2573_s9  ;;  %p149_p10 = scmp.eq.s32.totalorder %s1472_s5, 3 }
  0x4b   : > { %s2223_s3 = scalar_select %p130_p3, %s1954_s14, %s132_s26  }
  0x4c   : > { %s191_s7 = sand.u32 1, %s1966_s17   ;;  %p2226_p12 = por %p149_p10, %p148_p7 }
  0x4d   : > { %s1478_s27 = sshll.u32 %s191_s7, 7  ;;  %s1558_s28 = sshll.u32 %s1990_s23, 7 }
  0x4e   : > { %s2576_s30 = scalar_select %p2226_p12, 1, 0 }
  0x4f   : > { %s195_s24 = scalar_lea.vmem [#allocation6], %s1478_s27  ;;  %s2234_s10 = scalar_lea.hbm %s2540_s1, %s1558_s28 }
  0x50   : > { %s205_s9 = sshll.u32 %s195_s24, 4  ;;  %p2577_p8 = scmp.lt.s32.totalorder %s1998_s25, 4  ;;  %s2236_s9 = int_to_ptr.vmem [resolvable:$true] %s205_s9 }
  0x51   : > { %s2246_s24 = scalar_lea.sflag [#allocation7], %s191_s7  ;;  %s1818_s5 = scalar_lea.hbm %s2234_s10, 2048 }
  0x52   : > { %p2242_p9 = pnand %p2577_p8, %p2190_p5  ;;  %p1819_p11 = scmp.ne.s32.totalorder %s2234_s10, %s1818_s5 }
  0x53   : > { %s1823_s26 = scalar_lea.hbm %s2540_s1, 4096  ;;  %p1824_p5 = scmp.lt.u32.totalorder %s2234_s10, %s2540_s1 }
  0x54   : > { %p1820_p0 = pneg %p2242_p9  ;;  %p1825_p3 = scmp.lt.u32.totalorder %s1823_s26, %s1818_s5 }
  0x55   : > { %p1827_p10 = scmp.lt.u32.totalorder %s1818_s5, %s2234_s10 }
  0x56   : > { %p1821_p2 = pnand %p1820_p0, %p1819_p11  ;;  %p1826_p7 = por %p1825_p3, %p1824_p5 }
  0x58   : > { %p1822_p4 = pneg %p1821_p2  ;;  %p1828_p8 = por %p1827_p10, %p1826_p7 }
  0x5a   : > { %p1829_p12 = pnand %p1828_p8, %p1822_p4 }
  0x5c   : > { %1832 = shalt.err (!%p1829_p12)
}
  0x5d   : > { %s1833_s27 = scalar_lea.vmem %s2236_s9, 2048  ;;  %s2003_s8 = smov [#allocation6]  }
  0x5e   : > { %p1834_p11 = scmp.ne.s32.totalorder %s2236_s9, %s1833_s27  ;;  %s1838_s29 = sshll.u32 %s2003_s8, 4  ;;  %s1839_s29 = int_to_ptr.vmem [resolvable:$false] %s1838_s29 }
  0x5f   : > { %s1840_s7 = scalar_lea.vmem %s1839_s29, 4096  ;;  %p1841_p13 = scmp.lt.s32.totalorder %s2236_s9, %s1839_s29 }
  0x60   : > { %p1836_p2 = pnand %p1834_p11, %p1820_p0  ;;  %p1842_p5 = scmp.lt.s32.totalorder %s1840_s7, %s1833_s27 }
  0x62   : > { %p1837_p1 = pneg %p1836_p2  ;;  %p1843_p3 = por %p1842_p5, %p1841_p13 }
  0x64   : > { %p1844_p7 = pnand %p1843_p3, %p1837_p1 }
  0x66   : > { %1847 = shalt.err (!%p1844_p7)
}
  0x67   : > { %s2004_s5 = smov 256   ;;  %s2005_s2 = smov 128  }
  0x68   : > { %s2006_s22 = smov 8   ;;  %225 = sbr.rel (%p2169_p6) target bundleno = 441 (0x1b9), region = 32 }
  0x69   : > { %1620 = dma.hbm_to_vmem [thread:$0]  (!%p2242_p9), %s2234_s10, 2048, %s2236_s9, %s2246_s24, %s2004_s5, %s2005_s2, %s2006_s22  }
  0x6a   : > { %s227_s26 = sand.u32 (!%p2169_p6), 1, %s1974_s19   ;;  %p2579_p13 = scmp.ne.s32.totalorder (!%p2169_p6), %s2561_s4, 0 }
  0x6b   : > { %s1482_s28 = sshll.u32 (!%p2169_p6), %s227_s26, 7  ;;  %s228_s18 = scalar_lea.sflag (!%p2169_p6), [#allocation4], %s227_s26 }
  0x6c   : > { %s2277_s27 = scalar_lea.vmem (!%p2169_p6), [#allocation3], %s1482_s28 }
  0x6f   : > { %1933 = dma.done.wait (%p2579_p13), %s228_s18, 2048  }
  0x70   : > { %1935 = vsyncadd (%p2579_p13), %s228_s18, 4294965248  ;;  %s236_s8 = sand.u32 1, %s1962_s16   ;;  %p2580_p6 = scmp.ne.s32.totalorder %s2569_s15, 0 }
  0x71   : > { %s1483_s0 = sshll.u32 %s236_s8, 7  ;;  %s237_s9 = scalar_lea.sflag [#allocation7], %s236_s8 }
  0x72   : > { %s2284_s10 = scalar_lea.vmem [#allocation6], %s1483_s0 }
  0x73   : > { %1937 = dma.done.wait (%p2580_p6), %s237_s9, 2048  }
  0x74   : > { %1939 = vsyncadd (%p2580_p6), %s237_s9, 4294965248  ;;  %v2007_v0 = vmov 0   ;;  %v1748_v1 = vld [vmem:[%s2284_s10 + $0x4] ss:$8 sps:$4 sm:$0xff]   ;;  %v1750_v2 = vld [vmem:[%s2284_s10] ss:$8 sps:$4 sm:$0xff]   ;;  %v1029_v33 = vlaneseq }
  0x75   : > { %671 = vmatprep.mubr.bf16.mxu0 %v2007_v0  ;;  %751 = vmatprep.mubr.bf16.mxu1 %v2007_v0  ;;  %v1751_v3 = vld [vmem:[%s2284_s10 + $0x14] ss:$8 sps:$4 sm:$0xff]   ;;  %v1753_v4 = vld [vmem:[%s2284_s10 + $0x10] ss:$8 sps:$4 sm:$0xff]   ;;  %v1754_v5 = vld [vmem:[%s2284_s10 + $0x24] ss:$8 sps:$4 sm:$0xff]  }
  0x76   : > { %639 = vmatprep.subr.bf16.mxu0 %v1748_v1  ;;  %1592 = vmatprep.subr.bf16.mxu1 %v1748_v1  ;;  %v1756_v6 = vld [vmem:[%s2284_s10 + $0x20] ss:$8 sps:$4 sm:$0xff]   ;;  %v1757_v7 = vld [vmem:[%s2284_s10 + $0x34] ss:$8 sps:$4 sm:$0xff]   ;;  %v1759_v8 = vld [vmem:[%s2284_s10 + $0x30] ss:$8 sps:$4 sm:$0xff]  }
  0x77   : > { %640 = vmatpush1.bf16.msra.mxu0 %v1750_v2  ;;  %1600 = vmatpush1.bf16.msra.mxu1 %v1750_v2  ;;  %v1760_v9 = vld [vmem:[%s2284_s10 + $0x44] ss:$8 sps:$4 sm:$0xff]   ;;  %v1762_v10 = vld [vmem:[%s2284_s10 + $0x40] ss:$8 sps:$4 sm:$0xff]   ;;  %v1763_v11 = vld [vmem:[%s2284_s10 + $0x54] ss:$8 sps:$4 sm:$0xff]  }
  0x78   : > { %641 = vmatprep.subr.bf16.mxu0 %v1751_v3  ;;  %1593 = vmatprep.subr.bf16.mxu1 %v1751_v3  ;;  %v1765_v12 = vld [vmem:[%s2284_s10 + $0x50] ss:$8 sps:$4 sm:$0xff]   ;;  %v1766_v13 = vld [vmem:[%s2284_s10 + $0x64] ss:$8 sps:$4 sm:$0xff]   ;;  %v1768_v14 = vld [vmem:[%s2284_s10 + $0x60] ss:$8 sps:$4 sm:$0xff]  }
  0x79   : > { %v1769_v15 = vld [vmem:[%s2284_s10 + $0x74] ss:$8 sps:$4 sm:$0xff]   ;;  %v1771_v16 = vld [vmem:[%s2284_s10 + $0x70] ss:$8 sps:$4 sm:$0xff]   ;;  %v1772_v17 = vld [vmem:[%s2277_s27] sm:$0xff]   ;;  %s2339_s4 = sshll.u32 %s1982_s21, 1 }
  0x7a   : > { %v1773_v18 = vld [vmem:[%s2277_s27 + $0x40] sm:$0xff]   ;;  %v1774_v19 = vld [vmem:[%s2277_s27 + $0x8] sm:$0xff]   ;;  %v1776_v21 = vld [vmem:[%s2277_s27 + $0x10] sm:$0xff]   ;;  %p276_p1 = scmp.lt.s32.totalorder %s2339_s4, 3  ;;  %v1030_v34 = vshrl.u32 %v1029_v33, 7  ;;  %s2581_s29 = sld [smem:[#allocation19_spill]] }
  0x7b   : > { %642 = vmatpush1.bf16.msra.mxu0 %v1753_v4  ;;  %1601 = vmatpush1.bf16.msra.mxu1 %v1753_v4  ;;  %v1775_v20 = vld [vmem:[%s2277_s27 + $0x48] sm:$0xff]   ;;  %v1777_v22 = vld [vmem:[%s2277_s27 + $0x50] sm:$0xff]   ;;  %v1778_v23 = vld [vmem:[%s2277_s27 + $0x18] sm:$0xff]   ;;  %s269_s5 = sand.u32 1, %s1950_s13   ;;  %s2582_s22 = sld [smem:[#allocation12_spill]] }
  0x7c   : > { %643 = vmatprep.subr.bf16.mxu0 %v1754_v5  ;;  %1594 = vmatprep.subr.bf16.mxu1 %v1754_v5  ;;  %v1779_v24 = vld [vmem:[%s2277_s27 + $0x58] sm:$0xff]   ;;  %v1780_v25 = vld [vmem:[%s2277_s27 + $0x20] sm:$0xff]   ;;  %v1782_v27 = vld [vmem:[%s2277_s27 + $0x28] sm:$0xff]   ;;  %s277_s11 = scalar_select %p276_p1, %s2339_s4, 3  ;;  %v1031_v35 = vsub.s32 0, %v1030_v34  ;;  %v1035_v37 = vsub.s32 1, %v1030_v34 }
  0x7d   : > { %v1781_v26 = vld [vmem:[%s2277_s27 + $0x60] sm:$0xff]   ;;  %v1783_v28 = vld [vmem:[%s2277_s27 + $0x68] sm:$0xff]   ;;  %v1784_v29 = vld [vmem:[%s2277_s27 + $0x30] sm:$0xff]   ;;  %s1484_s21 = sshll.u32 %s269_s5, 8  ;;  %s2583_s8 = sld [smem:[#allocation17_spill]] }
  0x7e   : > { %v1785_v30 = vld [vmem:[%s2277_s27 + $0x70] sm:$0xff]   ;;  %v1786_v31 = vld [vmem:[%s2277_s27 + $0x38] sm:$0xff]   ;;  %s2361_s2 = scalar_lea.vmem [#allocation8], %s1484_s21  ;;  %s2584_s10 = sld [smem:[#allocation20_spill]] }
  0x7f   : > { %644 = vmatpush1.bf16.msra.mxu0 %v1756_v6  ;;  %1602 = vmatpush1.bf16.msra.mxu1 %v1756_v6  ;;  %v1787_v32 = vld [vmem:[%s2277_s27 + $0x78] sm:$0xff]   ;;  %s1344_s27 = sshll.u32 %s2361_s2, 4  ;;  %s2008_s24 = smov [#allocation8]   ;;  %s2455_s27 = int_to_ptr.vmem [resolvable:$true] %s1344_s27 }
  0x80   : > { %645 = vmatprep.subr.bf16.mxu0 %v1757_v7  ;;  %1595 = vmatprep.subr.bf16.mxu1 %v1757_v7  ;;  %s278_s7 = scalar_lea.vmem %s2581_s29, %s277_s11  ;;  %s2463_s11 = scalar_lea.sflag [#allocation5], %s269_s5 }
  0x81   : > { %v1027_v36 = vld [vmem:[%s278_s7] sm:$0x3]  ;;  %s1591_s26 = sshll.u32 %s2582_s22, 7  ;;  %s1848_s15 = scalar_lea.vmem %s2455_s27, 4096 }
  0x82   : > { %v2346_v38 = vrot.slane %v1027_v36, %v1031_v35  ;;  %v2349_v39 = vrot.slane %v1027_v36, %v1035_v37  ;;  %s1341_s28 = sadd.s32 %s1591_s26, %s2339_s4  ;;  %p1849_p12 = scmp.ne.s32.totalorder %s2455_s27, %s1848_s15 }
  0x83   : > { %646 = vmatpush1.bf16.msra.mxu0 %v1759_v8  ;;  %1603 = vmatpush1.bf16.msra.mxu1 %v1759_v8  ;;  %s1554_s18 = sshll.u32 %s1341_s28, 6  ;;  %p2585_p9 = scmp.ne.s32.totalorder %s2583_s8, 0 }
  0x84   : > { %647 = vmatprep.subr.bf16.mxu0 %v1760_v9  ;;  %1596 = vmatprep.subr.bf16.mxu1 %v1760_v9  ;;  %s2453_s4 = scalar_lea.hbm %s2584_s10, %s1554_s18  ;;  %s1852_s29 = sshll.u32 %s2008_s24, 4  ;;  %s1853_s29 = int_to_ptr.vmem [resolvable:$false] %s1852_s29 }
  0x85   : > { %p1850_p0 = pnand %p1849_p12, %p2585_p9  ;;  %s1854_s7 = scalar_lea.vmem %s1853_s29, 8192 }
  0x86   : > { %p1855_p10 = scmp.lt.s32.totalorder %s2455_s27, %s1853_s29  ;;  %p1856_p8 = scmp.lt.s32.totalorder %s1854_s7, %s1848_s15 }
  0x87   : > { %648 = vmatpush1.bf16.msra.mxu0 %v1762_v10  ;;  %1604 = vmatpush1.bf16.msra.mxu1 %v1762_v10  ;;  %p1851_p4 = pneg %p1850_p0 }
  0x88   : > { %649 = vmatprep.subr.bf16.mxu0 %v1763_v11  ;;  %1597 = vmatprep.subr.bf16.mxu1 %v1763_v11  ;;  %p1857_p11 = por %p1856_p8, %p1855_p10 }
  0x8a   : > { %p1858_p2 = pnand %p1857_p11, %p1851_p4 }
  0x8b   : > { %650 = vmatpush1.bf16.msra.mxu0 %v1765_v12  ;;  %1605 = vmatpush1.bf16.msra.mxu1 %v1765_v12 }
  0x8c   : > { %651 = vmatprep.subr.bf16.mxu0 %v1766_v13  ;;  %1598 = vmatprep.subr.bf16.mxu1 %v1766_v13 }
  0x8f   : > { %652 = vmatpush1.bf16.msra.mxu0 %v1768_v14  ;;  %1606 = vmatpush1.bf16.msra.mxu1 %v1768_v14 }
  0x90   : > { %653 = vmatprep.subr.bf16.mxu0 %v1769_v15  ;;  %1599 = vmatprep.subr.bf16.mxu1 %v1769_v15 }
  0x93   : > { %654 = vmatpush1.bf16.msra.mxu0 %v1771_v16  ;;  %1607 = vmatpush1.bf16.msra.mxu1 %v1771_v16 }
  0x96   : > { %672 = vmatmul.mubr.bf16.vlgmr.msra.gmra.mrb[0].mxu0 %v1772_v17  ;;  %752 = vmatmul.mubr.bf16.vlgmr.msra.gmra.mrb[0].mxu1 %v1773_v18 }
  0x97   : > { %681 = vmatprep.mubr.bf16.mxu0 %v2007_v0  ;;  %761 = vmatprep.mubr.bf16.mxu1 %v2007_v0 }
  0x9e   : > { %682 = vmatmul.mubr.bf16.gmra.mrb[4].mxu0 %v1774_v19  ;;  %762 = vmatmul.mubr.bf16.gmra.mrb[4].mxu1 %v1775_v20 }
  0x9f   : > { %691 = vmatprep.mubr.bf16.mxu0 %v2007_v0  ;;  %771 = vmatprep.mubr.bf16.mxu1 %v2007_v0 }
  0xa6   : > { %692 = vmatmul.mubr.bf16.gmra.mrb[8].mxu0 %v1776_v21  ;;  %772 = vmatmul.mubr.bf16.gmra.mrb[8].mxu1 %v1777_v22 }
  0xa7   : > { %701 = vmatprep.mubr.bf16.mxu0 %v2007_v0  ;;  %781 = vmatprep.mubr.bf16.mxu1 %v2007_v0 }
  0xae   : > { %702 = vmatmul.mubr.bf16.gmra.mrb[12].mxu0 %v1778_v23  ;;  %782 = vmatmul.mubr.bf16.gmra.mrb[12].mxu1 %v1779_v24 }
  0xaf   : > { %711 = vmatprep.mubr.bf16.mxu0 %v2007_v0  ;;  %791 = vmatprep.mubr.bf16.mxu1 %v2007_v0 }
  0xb6   : > { %712 = vmatmul.mubr.bf16.gmra.mrb[16].mxu0 %v1780_v25  ;;  %792 = vmatmul.mubr.bf16.gmra.mrb[16].mxu1 %v1781_v26 }
  0xb7   : > { %721 = vmatprep.mubr.bf16.mxu0 %v2007_v0  ;;  %801 = vmatprep.mubr.bf16.mxu1 %v2007_v0 }
  0xbe   : > { %722 = vmatmul.mubr.bf16.gmra.mrb[20].mxu0 %v1782_v27  ;;  %802 = vmatmul.mubr.bf16.gmra.mrb[20].mxu1 %v1783_v28 }
  0xbf   : > { %731 = vmatprep.mubr.bf16.mxu0 %v2007_v0  ;;  %811 = vmatprep.mubr.bf16.mxu1 %v2007_v0 }
  0xc6   : > { %732 = vmatmul.mubr.bf16.gmra.mrb[24].mxu0 %v1784_v29  ;;  %812 = vmatmul.mubr.bf16.gmra.mrb[24].mxu1 %v1785_v30 }
  0xc7   : > { %741 = vmatprep.mubr.bf16.mxu0 %v2007_v0  ;;  %821 = vmatprep.mubr.bf16.mxu1 %v2007_v0 }
  0xce   : > { %742 = vmatmul.mubr.bf16.gmra.mrb[28].mxu0 %v1786_v31  ;;  %822 = vmatmul.mubr.bf16.gmra.mrb[28].mxu1 %v1787_v32 }
 0x169   : > { %v673_v40 = vpop.f32.mrb[0].mxu0  ;;  %v753_v41 = vpop.f32.mrb[0].mxu1 }
 0x16a   : > { %v1039_v42 = vadd.f32 %v2346_v38, %v673_v40  ;;  %v1071_v43 = vadd.f32 %v2346_v38, %v753_v41  ;;  %v675_v44 = vpop.f32.mrb[1].mxu0  ;;  %v755_v45 = vpop.f32.mrb[1].mxu1 }
 0x16b   : > { %v1040_v46 = vadd.f32 %v2349_v39, %v675_v44  ;;  %v1072_v47 = vadd.f32 %v2349_v39, %v755_v45  ;;  %v677_v48 = vpop.f32.mrb[2].mxu0  ;;  %v757_v49 = vpop.f32.mrb[2].mxu1 }
 0x16c   : > { %v1041_v50 = vadd.f32 %v2346_v38, %v677_v48  ;;  %v1073_v51 = vadd.f32 %v2346_v38, %v757_v49  ;;  %v679_v52 = vpop.f32.mrb[3].mxu0  ;;  %v759_v53 = vpop.f32.mrb[3].mxu1 }
 0x16d   : > { %v1559_v54 = vpack.c.bf16 %v1040_v46, %v1039_v42  ;;  %v1575_v55 = vpack.c.bf16 %v1072_v47, %v1071_v43  ;;  %v1042_v56 = vadd.f32 %v2349_v39, %v679_v52  ;;  %v1074_v57 = vadd.f32 %v2349_v39, %v759_v53 }
 0x16f   : > { %1295 = vst [vmem:[%s2361_s2] sm:$0xff] %v1559_v54  ;;  %1311 = vst [vmem:[%s2361_s2 + $0x80] sm:$0xff] %v1575_v55  ;;  %v1560_v58 = vpack.c.bf16 %v1042_v56, %v1041_v50  ;;  %v1576_v59 = vpack.c.bf16 %v1074_v57, %v1073_v51 }
 0x171   : > { %1296 = vst [vmem:[%s2361_s2 + $0x8] sm:$0xff] %v1560_v58  ;;  %1312 = vst [vmem:[%s2361_s2 + $0x88] sm:$0xff] %v1576_v59  ;;  %v683_v60 = vpop.f32.mrb[4].mxu0  ;;  %v763_v61 = vpop.f32.mrb[4].mxu1 }
 0x172   : > { %v1043_v62 = vadd.f32 %v2346_v38, %v683_v60  ;;  %v1075_v63 = vadd.f32 %v2346_v38, %v763_v61  ;;  %v685_v0 = vpop.f32.mrb[5].mxu0  ;;  %v765_v1 = vpop.f32.mrb[5].mxu1 }
 0x173   : > { %v1044_v2 = vadd.f32 %v2349_v39, %v685_v0  ;;  %v1076_v3 = vadd.f32 %v2349_v39, %v765_v1  ;;  %v687_v4 = vpop.f32.mrb[6].mxu0  ;;  %v767_v5 = vpop.f32.mrb[6].mxu1 }
 0x174   : > { %v1045_v6 = vadd.f32 %v2346_v38, %v687_v4  ;;  %v1077_v7 = vadd.f32 %v2346_v38, %v767_v5  ;;  %v689_v8 = vpop.f32.mrb[7].mxu0  ;;  %v769_v9 = vpop.f32.mrb[7].mxu1 }
 0x175   : > { %v1561_v10 = vpack.c.bf16 %v1044_v2, %v1043_v62  ;;  %v1577_v11 = vpack.c.bf16 %v1076_v3, %v1075_v63  ;;  %v1046_v12 = vadd.f32 %v2349_v39, %v689_v8  ;;  %v1078_v13 = vadd.f32 %v2349_v39, %v769_v9 }
 0x177   : > { %1297 = vst [vmem:[%s2361_s2 + $0x10] sm:$0xff] %v1561_v10  ;;  %1313 = vst [vmem:[%s2361_s2 + $0x90] sm:$0xff] %v1577_v11  ;;  %v1562_v14 = vpack.c.bf16 %v1046_v12, %v1045_v6  ;;  %v1578_v15 = vpack.c.bf16 %v1078_v13, %v1077_v7 }
 0x179   : > { %1298 = vst [vmem:[%s2361_s2 + $0x18] sm:$0xff] %v1562_v14  ;;  %1314 = vst [vmem:[%s2361_s2 + $0x98] sm:$0xff] %v1578_v15  ;;  %v693_v16 = vpop.f32.mrb[8].mxu0  ;;  %v773_v17 = vpop.f32.mrb[8].mxu1 }
 0x17a   : > { %v1047_v18 = vadd.f32 %v2346_v38, %v693_v16  ;;  %v1079_v19 = vadd.f32 %v2346_v38, %v773_v17  ;;  %v695_v20 = vpop.f32.mrb[9].mxu0  ;;  %v775_v21 = vpop.f32.mrb[9].mxu1 }
 0x17b   : > { %v1048_v22 = vadd.f32 %v2349_v39, %v695_v20  ;;  %v1080_v23 = vadd.f32 %v2349_v39, %v775_v21  ;;  %v697_v24 = vpop.f32.mrb[10].mxu0  ;;  %v777_v25 = vpop.f32.mrb[10].mxu1 }
 0x17c   : > { %v1049_v26 = vadd.f32 %v2346_v38, %v697_v24  ;;  %v1081_v27 = vadd.f32 %v2346_v38, %v777_v25  ;;  %v699_v28 = vpop.f32.mrb[11].mxu0  ;;  %v779_v29 = vpop.f32.mrb[11].mxu1 }
 0x17d   : > { %v1563_v30 = vpack.c.bf16 %v1048_v22, %v1047_v18  ;;  %v1579_v31 = vpack.c.bf16 %v1080_v23, %v1079_v19  ;;  %v1050_v32 = vadd.f32 %v2349_v39, %v699_v28  ;;  %v1082_v33 = vadd.f32 %v2349_v39, %v779_v29 }
 0x17f   : > { %1299 = vst [vmem:[%s2361_s2 + $0x20] sm:$0xff] %v1563_v30  ;;  %1315 = vst [vmem:[%s2361_s2 + $0xa0] sm:$0xff] %v1579_v31  ;;  %v1564_v34 = vpack.c.bf16 %v1050_v32, %v1049_v26  ;;  %v1580_v35 = vpack.c.bf16 %v1082_v33, %v1081_v27 }
 0x181   : > { %1300 = vst [vmem:[%s2361_s2 + $0x28] sm:$0xff] %v1564_v34  ;;  %1316 = vst [vmem:[%s2361_s2 + $0xa8] sm:$0xff] %v1580_v35  ;;  %v703_v36 = vpop.f32.mrb[12].mxu0  ;;  %v783_v37 = vpop.f32.mrb[12].mxu1 }
 0x182   : > { %v1051_v40 = vadd.f32 %v2346_v38, %v703_v36  ;;  %v1083_v41 = vadd.f32 %v2346_v38, %v783_v37  ;;  %v705_v42 = vpop.f32.mrb[13].mxu0  ;;  %v785_v43 = vpop.f32.mrb[13].mxu1 }
 0x183   : > { %v1052_v44 = vadd.f32 %v2349_v39, %v705_v42  ;;  %v1084_v45 = vadd.f32 %v2349_v39, %v785_v43  ;;  %v707_v46 = vpop.f32.mrb[14].mxu0  ;;  %v787_v47 = vpop.f32.mrb[14].mxu1 }
 0x184   : > { %v1053_v48 = vadd.f32 %v2346_v38, %v707_v46  ;;  %v1085_v49 = vadd.f32 %v2346_v38, %v787_v47  ;;  %v709_v50 = vpop.f32.mrb[15].mxu0  ;;  %v789_v51 = vpop.f32.mrb[15].mxu1 }
 0x185   : > { %v1565_v52 = vpack.c.bf16 %v1052_v44, %v1051_v40  ;;  %v1581_v53 = vpack.c.bf16 %v1084_v45, %v1083_v41  ;;  %v1054_v54 = vadd.f32 %v2349_v39, %v709_v50  ;;  %v1086_v55 = vadd.f32 %v2349_v39, %v789_v51 }
 0x187   : > { %1301 = vst [vmem:[%s2361_s2 + $0x30] sm:$0xff] %v1565_v52  ;;  %1317 = vst [vmem:[%s2361_s2 + $0xb0] sm:$0xff] %v1581_v53  ;;  %v1566_v56 = vpack.c.bf16 %v1054_v54, %v1053_v48  ;;  %v1582_v57 = vpack.c.bf16 %v1086_v55, %v1085_v49 }
 0x189   : > { %1302 = vst [vmem:[%s2361_s2 + $0x38] sm:$0xff] %v1566_v56  ;;  %1318 = vst [vmem:[%s2361_s2 + $0xb8] sm:$0xff] %v1582_v57  ;;  %v713_v58 = vpop.f32.mrb[16].mxu0  ;;  %v793_v59 = vpop.f32.mrb[16].mxu1 }
 0x18a   : > { %v1055_v60 = vadd.f32 %v2346_v38, %v713_v58  ;;  %v1087_v61 = vadd.f32 %v2346_v38, %v793_v59  ;;  %v715_v62 = vpop.f32.mrb[17].mxu0  ;;  %v795_v63 = vpop.f32.mrb[17].mxu1 }
 0x18b   : > { %v1056_v0 = vadd.f32 %v2349_v39, %v715_v62  ;;  %v1088_v1 = vadd.f32 %v2349_v39, %v795_v63  ;;  %v717_v2 = vpop.f32.mrb[18].mxu0  ;;  %v797_v3 = vpop.f32.mrb[18].mxu1 }
 0x18c   : > { %v1057_v4 = vadd.f32 %v2346_v38, %v717_v2  ;;  %v1089_v5 = vadd.f32 %v2346_v38, %v797_v3  ;;  %v719_v6 = vpop.f32.mrb[19].mxu0  ;;  %v799_v7 = vpop.f32.mrb[19].mxu1 }
 0x18d   : > { %v1567_v8 = vpack.c.bf16 %v1056_v0, %v1055_v60  ;;  %v1583_v9 = vpack.c.bf16 %v1088_v1, %v1087_v61  ;;  %v1058_v10 = vadd.f32 %v2349_v39, %v719_v6  ;;  %v1090_v11 = vadd.f32 %v2349_v39, %v799_v7 }
 0x18f   : > { %1303 = vst [vmem:[%s2361_s2 + $0x40] sm:$0xff] %v1567_v8  ;;  %1319 = vst [vmem:[%s2361_s2 + $0xc0] sm:$0xff] %v1583_v9  ;;  %v1568_v12 = vpack.c.bf16 %v1058_v10, %v1057_v4  ;;  %v1584_v13 = vpack.c.bf16 %v1090_v11, %v1089_v5 }
 0x191   : > { %1304 = vst [vmem:[%s2361_s2 + $0x48] sm:$0xff] %v1568_v12  ;;  %1320 = vst [vmem:[%s2361_s2 + $0xc8] sm:$0xff] %v1584_v13  ;;  %v723_v14 = vpop.f32.mrb[20].mxu0  ;;  %v803_v15 = vpop.f32.mrb[20].mxu1 }
 0x192   : > { %v1059_v16 = vadd.f32 %v2346_v38, %v723_v14  ;;  %v1091_v17 = vadd.f32 %v2346_v38, %v803_v15  ;;  %v725_v18 = vpop.f32.mrb[21].mxu0  ;;  %v805_v19 = vpop.f32.mrb[21].mxu1 }
 0x193   : > { %v1060_v20 = vadd.f32 %v2349_v39, %v725_v18  ;;  %v1092_v21 = vadd.f32 %v2349_v39, %v805_v19  ;;  %v727_v22 = vpop.f32.mrb[22].mxu0  ;;  %v807_v23 = vpop.f32.mrb[22].mxu1 }
 0x194   : > { %v1061_v24 = vadd.f32 %v2346_v38, %v727_v22  ;;  %v1093_v25 = vadd.f32 %v2346_v38, %v807_v23  ;;  %v729_v26 = vpop.f32.mrb[23].mxu0  ;;  %v809_v27 = vpop.f32.mrb[23].mxu1 }
 0x195   : > { %v1569_v28 = vpack.c.bf16 %v1060_v20, %v1059_v16  ;;  %v1585_v29 = vpack.c.bf16 %v1092_v21, %v1091_v17  ;;  %v1062_v30 = vadd.f32 %v2349_v39, %v729_v26  ;;  %v1094_v31 = vadd.f32 %v2349_v39, %v809_v27 }
 0x197   : > { %1305 = vst [vmem:[%s2361_s2 + $0x50] sm:$0xff] %v1569_v28  ;;  %1321 = vst [vmem:[%s2361_s2 + $0xd0] sm:$0xff] %v1585_v29  ;;  %v1570_v32 = vpack.c.bf16 %v1062_v30, %v1061_v24  ;;  %v1586_v33 = vpack.c.bf16 %v1094_v31, %v1093_v25 }
 0x199   : > { %1306 = vst [vmem:[%s2361_s2 + $0x58] sm:$0xff] %v1570_v32  ;;  %1322 = vst [vmem:[%s2361_s2 + $0xd8] sm:$0xff] %v1586_v33  ;;  %v733_v34 = vpop.f32.mrb[24].mxu0  ;;  %v813_v35 = vpop.f32.mrb[24].mxu1 }
 0x19a   : > { %v1063_v36 = vadd.f32 %v2346_v38, %v733_v34  ;;  %v1095_v37 = vadd.f32 %v2346_v38, %v813_v35  ;;  %v735_v40 = vpop.f32.mrb[25].mxu0  ;;  %v815_v41 = vpop.f32.mrb[25].mxu1 }
 0x19b   : > { %v1064_v42 = vadd.f32 %v2349_v39, %v735_v40  ;;  %v1096_v43 = vadd.f32 %v2349_v39, %v815_v41  ;;  %v737_v44 = vpop.f32.mrb[26].mxu0  ;;  %v817_v45 = vpop.f32.mrb[26].mxu1 }
 0x19c   : > { %v1065_v46 = vadd.f32 %v2346_v38, %v737_v44  ;;  %v1097_v47 = vadd.f32 %v2346_v38, %v817_v45  ;;  %v739_v48 = vpop.f32.mrb[27].mxu0  ;;  %v819_v49 = vpop.f32.mrb[27].mxu1 }
 0x19d   : > { %v1571_v50 = vpack.c.bf16 %v1064_v42, %v1063_v36  ;;  %v1587_v51 = vpack.c.bf16 %v1096_v43, %v1095_v37  ;;  %v1066_v52 = vadd.f32 %v2349_v39, %v739_v48  ;;  %v1098_v53 = vadd.f32 %v2349_v39, %v819_v49 }
 0x19f   : > { %1307 = vst [vmem:[%s2361_s2 + $0x60] sm:$0xff] %v1571_v50  ;;  %1323 = vst [vmem:[%s2361_s2 + $0xe0] sm:$0xff] %v1587_v51  ;;  %v1572_v54 = vpack.c.bf16 %v1066_v52, %v1065_v46  ;;  %v1588_v55 = vpack.c.bf16 %v1098_v53, %v1097_v47 }
 0x1a1   : > { %1308 = vst [vmem:[%s2361_s2 + $0x68] sm:$0xff] %v1572_v54  ;;  %1324 = vst [vmem:[%s2361_s2 + $0xe8] sm:$0xff] %v1588_v55  ;;  %v743_v56 = vpop.f32.mrb[28].mxu0  ;;  %v823_v57 = vpop.f32.mrb[28].mxu1 }
 0x1a2   : > { %v1067_v58 = vadd.f32 %v2346_v38, %v743_v56  ;;  %v1099_v59 = vadd.f32 %v2346_v38, %v823_v57  ;;  %v745_v60 = vpop.f32.mrb[29].mxu0  ;;  %v825_v61 = vpop.f32.mrb[29].mxu1 }
 0x1a3   : > { %v1068_v62 = vadd.f32 %v2349_v39, %v745_v60  ;;  %v1100_v63 = vadd.f32 %v2349_v39, %v825_v61  ;;  %v747_v0 = vpop.f32.mrb[30].mxu0  ;;  %v827_v1 = vpop.f32.mrb[30].mxu1 }
 0x1a4   : > { %v1069_v2 = vadd.f32 %v2346_v38, %v747_v0  ;;  %v1101_v3 = vadd.f32 %v2346_v38, %v827_v1  ;;  %v749_v4 = vpop.f32.mrb[31].mxu0  ;;  %v829_v5 = vpop.f32.mrb[31].mxu1 }
 0x1a5   : > { %v1573_v6 = vpack.c.bf16 %v1068_v62, %v1067_v58  ;;  %v1589_v7 = vpack.c.bf16 %v1100_v63, %v1099_v59  ;;  %v1070_v8 = vadd.f32 %v2349_v39, %v749_v4  ;;  %v1102_v9 = vadd.f32 %v2349_v39, %v829_v5 }
 0x1a7   : > { %1309 = vst [vmem:[%s2361_s2 + $0x70] sm:$0xff] %v1573_v6  ;;  %1325 = vst [vmem:[%s2361_s2 + $0xf0] sm:$0xff] %v1589_v7  ;;  %v1574_v38 = vpack.c.bf16 %v1070_v8, %v1069_v2  ;;  %v1590_v10 = vpack.c.bf16 %v1102_v9, %v1101_v3 }
 0x1a9   : > { %1310 = vst [vmem:[%s2361_s2 + $0x78] sm:$0xff] %v1574_v38  ;;  %1326 = vst [vmem:[%s2361_s2 + $0xf8] sm:$0xff] %v1590_v10 }
 0x1aa   : > { %1861 = shalt.err (!%p1858_p2)
}
 0x1ab   : > { %s1862_s5 = scalar_lea.hbm %s2453_s4, 4096  ;;  %s1866_s22 = scalar_lea.hbm %s2584_s10, 16384 }
 0x1ac   : > { %p1863_p5 = scmp.ne.s32.totalorder %s2453_s4, %s1862_s5  ;;  %p1867_p13 = scmp.lt.u32.totalorder %s2453_s4, %s2584_s10 }
 0x1ad   : > { %p1868_p6 = scmp.lt.u32.totalorder %s1866_s22, %s1862_s5  ;;  %p1870_p12 = scmp.lt.u32.totalorder %s1862_s5, %s2453_s4 }
 0x1ae   : > { %p1864_p3 = pnand %p1863_p5, %p2585_p9 }
 0x1af   : > { %p1869_p1 = por %p1868_p6, %p1867_p13 }
 0x1b0   : > { %p1865_p7 = pneg %p1864_p3 }
 0x1b1   : > { %p1871_p0 = por %p1870_p12, %p1869_p1 }
 0x1b3   : > { %p1872_p4 = pnand %p1871_p0, %p1865_p7 }
 0x1b5   : > { %1875 = shalt.err (!%p1872_p4)
}
 0x1b6   : > { %s2009_s18 = smov 128   ;;  %s2010_s0 = smov 256  }
 0x1b7   : > { %s2011_s9 = smov 8  }
 0x1b8   : > { %1612 = dma.vmem_to_hbm [thread:$0]  (%p2585_p9), %s2455_s27, 4096, %s2453_s4, %s2463_s11, %s2009_s18, %s2010_s0, %s2011_s9  }
 0x1b9 PF: > { %p1626_p10 = scmp.ge.s32.totalorder %s1998_s25, 2  ;;  %s1359_s15 = sand.u32 1, %s1946_s12  }
 0x1ba   : > { %p2586_p8 = scmp.ne.s32.totalorder %s2576_s30, 0  ;;  %s1360_s24 = scalar_lea.sflag [#allocation5], %s1359_s15 }
 0x1bc   : > { %p1622_p11 = pnand %p1626_p10, %p2586_p8 }
 0x1be   : > { %1941 = dma.done.wait (!%p1622_p11), %s1360_s24, 4096  }
 0x1bf   : > { %1943 = vsyncadd (!%p1622_p11), %s1360_s24, 4294963200  ;;  %s22_s25 = sadd.s32 1, %s1998_s25   ;;  %s2588_s27 = sld [smem:[#allocation16_spill]] }
 0x1c0   : > { %p2492_p2 = scmp.ge.s32.totalorder %s22_s25, 6   ;;  %s2589_s22 = sld [smem:[#allocation13_spill]] }
 0x1c1   : > { %s2590_s30 = sld [smem:[#allocation14_spill]]  ;;  %s2591_s24 = sld [smem:[#allocation15_spill]] }
 0x1c2   : > { %s2592_s12 = smov %s1950_s13  ;;  %s2593_s13 = smov %s1954_s14 }
 0x1c3   : > { %s2594_s14 = smov %s2223_s3  ;;  %s2595_s15 = smov %s1962_s16 }
 0x1c4   : > { %s2596_s16 = smov %s1966_s17  ;;  %s2598_s18 = smov %s1974_s19 }
 0x1c5   : > { %s2597_s17 = smov %s2588_s27  ;;  %s2599_s19 = smov %s1978_s20 }
 0x1c6   : > { %s2600_s20 = smov %s2220_s6  ;;  %s2601_s21 = smov %s1990_s23 }
 0x1c7   : > { %s2602_s23 = smov %s2590_s30  ;;  %21 = sbr.rel (!%p2492_p2) target bundleno = 16 (0x10), region = 101 }
 0x1ce   :  { %1365 = vsyncpa [#allocation4], 1 }
 0x1cf   :  { %1367 = vsyncpa [#allocation4 + $0x1], 1 }
 0x1d0   :  { %1368 = vsyncpa [#allocation7], 1 }
 0x1d1   :  { %1370 = vsyncpa [#allocation7 + $0x1], 1 }
 0x1d2   :  { %1371 = vsyncpa [#allocation5], 1 }
 0x1d3   :  { %1373 = vsyncpa [#allocation5 + $0x1], 1 }

</bundles_post_ra>
